<compile_context>
chip_gen: v6e
topology: v6e:2x2x1
jax: 0.10.0
libtpu: 0.0.40
codegen_flags: <defaults>
</compile_context>

<pallas_src>
import functools

import jax
import jax.numpy as jnp
from jax.experimental import pallas as pl
from jax.experimental.pallas import tpu as pltpu

SUBLANE = 8  # f32 sublane width; batch is padded to a multiple of this.


def _encoder_kernel(num_layers, T, Bp, *refs):
    """Single-invocation kernel; all operands resident in VMEM.

    refs = (x2d, wih_t[0..L-1], whh_t[0..L-1], bias[0..L-1], w_fc_t, b_fc, out2d)

    x2d:    (T*Bp, Z)    time-major rows, batch padded to sublane width
    wih_t:  (in_dim, H)  pre-transposed
    whh_t:  (H, H)       pre-transposed
    bias:   (1, H)       b_ih + b_hh pre-fused
    w_fc_t: (H, H)       pre-transposed
    b_fc:   (1, H)
    out2d:  (T*Bp, H)
    """
    n = num_layers
    x_ref = refs[0]
    wih_refs = refs[1:1 + n]
    whh_refs = refs[1 + n:1 + 2 * n]
    b_refs = refs[1 + 2 * n:1 + 3 * n]
    wfc_ref = refs[1 + 3 * n]
    bfc_ref = refs[2 + 3 * n]
    o_ref = refs[3 + 3 * n]

    H = o_ref.shape[-1]

    # Hoist all weight/bias loads out of the recurrence loops.
    wih = [wih_refs[l][...] for l in range(n)]
    whh = [whh_refs[l][...] for l in range(n)]
    bias = [b_refs[l][...] for l in range(n)]

    # Layer 0's non-recurrent contribution for ALL timesteps: one batched MXU call.
    pre0 = (jnp.dot(x_ref[...], wih[0], preferred_element_type=jnp.float32)
            + bias[0])  # (T*Bp, H)

    # Wavefront over the (layer, time) grid.  Cell (l, t) depends on (l-1, t)
    # (previous layer, same timestep -- produced on the previous diagonal and
    # still held in h_prev[l-1]) and (l, t-1) (same layer, previous timestep).
    # All cells on a diagonal s = l + t are independent, so their tiny
    # (8,H)@(H,H) dots can be issued back-to-back and overlap in the MXU.
    h_prev = [jnp.zeros((Bp, H), jnp.float32) for _ in range(n)]
    last_outs = [None] * T  # final layer's hidden state per timestep (registers)

    for s in range(T + n - 1):
        new_h = {}
        for l in range(max(0, s - T + 1), min(n, s + 1)):
            t = s - l
            if l == 0:
                pre = pre0[t * Bp:(t + 1) * Bp, :]                 # aligned (8, H)
            else:
                # Input to layer l at time t = layer l-1 output at time t,
                # computed on diagonal s-1 and currently stored in h_prev[l-1].
                pre = (jnp.dot(h_prev[l - 1], wih[l],
                               preferred_element_type=jnp.float32) + bias[l])
            rec = jnp.dot(h_prev[l], whh[l], preferred_element_type=jnp.float32)
            new_h[l] = jnp.tanh(pre + rec)
        # Commit the diagonal only after every cell on it has been computed.
        for l in sorted(new_h):
            h_prev[l] = new_h[l]
            if l == n - 1:
                last_outs[s - l] = new_h[l]

    # Final Linear over the whole sequence in one batched matmul; single store.
    seq = jnp.concatenate(last_outs, axis=0)  # (T*Bp, H), never touches VMEM scratch
    out = (jnp.dot(seq, wfc_ref[...], preferred_element_type=jnp.float32)
           + bfc_ref[...])
    o_ref[...] = out.astype(o_ref.dtype)


def prepare_params(params, *, num_layers):
    """One-time packing (call at init, NOT per forward):
    pre-transpose all weights, fuse the two RNN biases, reshape biases to (1,H)."""
    H = params["w_fc"].shape[0]
    packed = []
    for l in range(num_layers):
        packed.append(jnp.transpose(params[f"w_ih_{l}"]))                      # (in, H)
    for l in range(num_layers):
        packed.append(jnp.transpose(params[f"w_hh_{l}"]))                      # (H, H)
    for l in range(num_layers):
        packed.append((params[f"b_ih_{l}"] + params[f"b_hh_{l}"]).reshape(1, H))
    packed.append(jnp.transpose(params["w_fc"]))                               # (H, H)
    packed.append(params["b_fc"].reshape(1, H))                                # (1, H)
    return tuple(jax.device_put(p) for p in packed)


def encoder_forward(x, packed_params, *, num_layers):
    """x: (T, B, z_dim) float32, packed_params from prepare_params()
    -> (T, B, hidden_dim) float32."""
    T, B, Z = x.shape
    H = packed_params[-1].shape[-1]
    Bp = ((B + SUBLANE - 1) // SUBLANE) * SUBLANE

    # Pad batch to sublane width so every per-timestep tile is an aligned
    # (8, H) block inside the kernel.  Padded rows are independent garbage
    # (row-wise recurrence) and are dropped after the call.
    if Bp != B:
        x = jnp.pad(x, ((0, 0), (0, Bp - B), (0, 0)))
    x2d = x.reshape(T * Bp, Z)

    # VMEM-budget sanity check for the no-grid "everything resident" design
    # (matters if shapes grow, esp. on v7x: 64 MiB physical / 32 MiB scoped).
    vmem_bytes = 4 * (x2d.size + T * Bp * H + sum(int(p.size) for p in packed_params))
    assert vmem_bytes < 16 * 1024 * 1024, (
        f"Encoder kernel VMEM footprint {vmem_bytes} B too large for the "
        "single-invocation design; introduce a grid/tiling.")

    kernel = functools.partial(_encoder_kernel, num_layers, T, Bp)

    out2d = pl.pallas_call(
        kernel,
        out_shape=jax.ShapeDtypeStruct((T * Bp, H), jnp.float32),
        # Single invocation (no grid): every operand is a full VMEM-resident
        # block; no per-timestep pipeline bookkeeping or tiny DMAs.
        in_specs=[pl.BlockSpec(memory_space=pltpu.MemorySpace.VMEM)
                  for _ in range(1 + len(packed_params))],
        out_specs=pl.BlockSpec(memory_space=pltpu.MemorySpace.VMEM),
    )(x2d, *packed_params)

    return out2d.reshape(T, Bp, H)[:, :B, :]


def init_params(key, z_dim, hidden_dim, num_layers):
    """Deterministic init mimicking PyTorch's U(-1/sqrt(H), 1/sqrt(H))."""
    bound = 1.0 / jnp.sqrt(hidden_dim)
    params = {}
    keys = jax.random.split(key, 4 * num_layers + 2)
    ki = 0
    for l in range(num_layers):
        in_dim = z_dim if l == 0 else hidden_dim
        params[f"w_ih_{l}"] = jax.random.uniform(
            keys[ki], (hidden_dim, in_dim), jnp.float32, -bound, bound); ki += 1
        params[f"w_hh_{l}"] = jax.random.uniform(
            keys[ki], (hidden_dim, hidden_dim), jnp.float32, -bound, bound); ki += 1
        params[f"b_ih_{l}"] = jax.random.uniform(
            keys[ki], (hidden_dim,), jnp.float32, -bound, bound); ki += 1
        params[f"b_hh_{l}"] = jax.random.uniform(
            keys[ki], (hidden_dim,), jnp.float32, -bound, bound); ki += 1
    params["w_fc"] = jax.random.uniform(
        keys[ki], (hidden_dim, hidden_dim), jnp.float32, -bound, bound); ki += 1
    params["b_fc"] = jax.random.uniform(
        keys[ki], (hidden_dim,), jnp.float32, -bound, bound)
    return params


def encoder_reference(x, params, *, num_layers):
    """Pure-JAX reference matching torch.nn.RNN(tanh) + Linear."""
    T, B, _ = x.shape
    H = params["w_fc"].shape[0]
    layer_in = x
    for l in range(num_layers):
        w_ih = params[f"w_ih_{l}"]
        w_hh = params[f"w_hh_{l}"]
        b_ih = params[f"b_ih_{l}"]
        b_hh = params[f"b_hh_{l}"]

        def step(h, xt):
            h_new = jnp.tanh(xt @ w_ih.T + b_ih + h @ w_hh.T + b_hh)
            return h_new, h_new

        h0 = jnp.zeros((B, H), jnp.float32)
        _, outs = jax.lax.scan(step, h0, layer_in)
        layer_in = outs
    return layer_in @ params["w_fc"].T + params["b_fc"]


if __name__ == "__main__":
    # Small shapes implied by the module: seq=8, batch=2, z_dim=4, hidden=32, layers=2
    T, B, Z, H, L = 8, 2, 4, 32, 2

    key = jax.random.PRNGKey(0)
    kx, kp = jax.random.split(key)
    x = jax.random.normal(kx, (T, B, Z), dtype=jnp.float32)
    params = init_params(kp, Z, H, L)

    # One-time parameter packing (hoisted out of the forward path).
    packed = prepare_params(params, num_layers=L)

    fwd = jax.jit(functools.partial(encoder_forward, num_layers=L))
    out = jax.block_until_ready(fwd(x, packed))

    ref = jax.block_until_ready(encoder_reference(x, params, num_layers=L))
    assert out.shape == (T, B, H)
    assert jnp.max(jnp.abs(out - ref)) < 1e-4, "Pallas output mismatch vs reference"

    print("KERNEL_OK")
</pallas_src>

<mosaic_0001>
module attributes {stable_mosaic.version = 11 : i64} {
  func.func @_encoder_kernel(%arg0: memref<64x4xf32, #tpu.memory_space<vmem>>, %arg1: memref<4x32xf32, #tpu.memory_space<vmem>>, %arg2: memref<32x32xf32, #tpu.memory_space<vmem>>, %arg3: memref<32x32xf32, #tpu.memory_space<vmem>>, %arg4: memref<32x32xf32, #tpu.memory_space<vmem>>, %arg5: memref<1x32xf32, #tpu.memory_space<vmem>>, %arg6: memref<1x32xf32, #tpu.memory_space<vmem>>, %arg7: memref<32x32xf32, #tpu.memory_space<vmem>>, %arg8: memref<1x32xf32, #tpu.memory_space<vmem>>, %arg9: memref<64x32xf32, #tpu.memory_space<vmem>>) attributes {dimension_semantics = [], scalar_prefetch = 0 : i64, scratch_operands = 0 : i64, tpu.core_type = #tpu.core_type<tc>} {
    %c0 = arith.constant 0 : index
    %c0_0 = arith.constant 0 : index
    %0 = vector.load %arg1[%c0, %c0_0] : memref<4x32xf32, #tpu.memory_space<vmem>>, vector<4x32xf32>
    %c0_1 = arith.constant 0 : index
    %c0_2 = arith.constant 0 : index
    %1 = vector.load %arg2[%c0_1, %c0_2] : memref<32x32xf32, #tpu.memory_space<vmem>>, vector<32x32xf32>
    %c0_3 = arith.constant 0 : index
    %c0_4 = arith.constant 0 : index
    %2 = vector.load %arg3[%c0_3, %c0_4] : memref<32x32xf32, #tpu.memory_space<vmem>>, vector<32x32xf32>
    %c0_5 = arith.constant 0 : index
    %c0_6 = arith.constant 0 : index
    %3 = vector.load %arg4[%c0_5, %c0_6] : memref<32x32xf32, #tpu.memory_space<vmem>>, vector<32x32xf32>
    %c0_7 = arith.constant 0 : index
    %c0_8 = arith.constant 0 : index
    %4 = vector.load %arg5[%c0_7, %c0_8] : memref<1x32xf32, #tpu.memory_space<vmem>>, vector<1x32xf32>
    %c0_9 = arith.constant 0 : index
    %c0_10 = arith.constant 0 : index
    %5 = vector.load %arg6[%c0_9, %c0_10] : memref<1x32xf32, #tpu.memory_space<vmem>>, vector<1x32xf32>
    %c0_11 = arith.constant 0 : index
    %c0_12 = arith.constant 0 : index
    %6 = vector.load %arg0[%c0_11, %c0_12] : memref<64x4xf32, #tpu.memory_space<vmem>>, vector<64x4xf32>
    %cst = arith.constant dense<0.000000e+00> : vector<64x32xf32>
    %7 = tpu.matmul %6, %0, %cst {dimension_numbers = #tpu.dot_dimension_numbers<[1], [0], [0], [1], [0, 0, 1, 1], [], []>} : vector<64x4xf32>, vector<4x32xf32>, vector<64x32xf32> -> vector<64x32xf32>
    %8 = vector.broadcast %4 : vector<1x32xf32> to vector<64x32xf32>
    %9 = arith.addf %7, %8 : vector<64x32xf32>
    %cst_13 = arith.constant 0.000000e+00 : f32
    %10 = vector.broadcast %cst_13 : f32 to vector<8x32xf32>
    %cst_14 = arith.constant 0.000000e+00 : f32
    %11 = vector.broadcast %cst_14 : f32 to vector<8x32xf32>
    %12 = vector.extract_strided_slice %9 {offsets = [0, 0], sizes = [8, 32], strides = [1, 1]} : vector<64x32xf32> to vector<8x32xf32>
    %cst_15 = arith.constant dense<0.000000e+00> : vector<8x32xf32>
    %13 = tpu.matmul %10, %2, %cst_15 {dimension_numbers = #tpu.dot_dimension_numbers<[1], [0], [0], [1], [0, 0, 1, 1], [], []>} : vector<8x32xf32>, vector<32x32xf32>, vector<8x32xf32> -> vector<8x32xf32>
    %14 = arith.addf %12, %13 : vector<8x32xf32>
    %15 = math.tanh %14 : vector<8x32xf32>
    %16 = vector.extract_strided_slice %9 {offsets = [8, 0], sizes = [8, 32], strides = [1, 1]} : vector<64x32xf32> to vector<8x32xf32>
    %cst_16 = arith.constant dense<0.000000e+00> : vector<8x32xf32>
    %17 = tpu.matmul %15, %2, %cst_16 {dimension_numbers = #tpu.dot_dimension_numbers<[1], [0], [0], [1], [0, 0, 1, 1], [], []>} : vector<8x32xf32>, vector<32x32xf32>, vector<8x32xf32> -> vector<8x32xf32>
    %18 = arith.addf %16, %17 : vector<8x32xf32>
    %19 = math.tanh %18 : vector<8x32xf32>
    %cst_17 = arith.constant dense<0.000000e+00> : vector<8x32xf32>
    %20 = tpu.matmul %15, %1, %cst_17 {dimension_numbers = #tpu.dot_dimension_numbers<[1], [0], [0], [1], [0, 0, 1, 1], [], []>} : vector<8x32xf32>, vector<32x32xf32>, vector<8x32xf32> -> vector<8x32xf32>
    %21 = vector.broadcast %5 : vector<1x32xf32> to vector<8x32xf32>
    %22 = arith.addf %20, %21 : vector<8x32xf32>
    %cst_18 = arith.constant dense<0.000000e+00> : vector<8x32xf32>
    %23 = tpu.matmul %11, %3, %cst_18 {dimension_numbers = #tpu.dot_dimension_numbers<[1], [0], [0], [1], [0, 0, 1, 1], [], []>} : vector<8x32xf32>, vector<32x32xf32>, vector<8x32xf32> -> vector<8x32xf32>
    %24 = arith.addf %22, %23 : vector<8x32xf32>
    %25 = math.tanh %24 : vector<8x32xf32>
    %26 = vector.extract_strided_slice %9 {offsets = [16, 0], sizes = [8, 32], strides = [1, 1]} : vector<64x32xf32> to vector<8x32xf32>
    %cst_19 = arith.constant dense<0.000000e+00> : vector<8x32xf32>
    %27 = tpu.matmul %19, %2, %cst_19 {dimension_numbers = #tpu.dot_dimension_numbers<[1], [0], [0], [1], [0, 0, 1, 1], [], []>} : vector<8x32xf32>, vector<32x32xf32>, vector<8x32xf32> -> vector<8x32xf32>
    %28 = arith.addf %26, %27 : vector<8x32xf32>
    %29 = math.tanh %28 : vector<8x32xf32>
    %cst_20 = arith.constant dense<0.000000e+00> : vector<8x32xf32>
    %30 = tpu.matmul %19, %1, %cst_20 {dimension_numbers = #tpu.dot_dimension_numbers<[1], [0], [0], [1], [0, 0, 1, 1], [], []>} : vector<8x32xf32>, vector<32x32xf32>, vector<8x32xf32> -> vector<8x32xf32>
    %31 = vector.broadcast %5 : vector<1x32xf32> to vector<8x32xf32>
    %32 = arith.addf %30, %31 : vector<8x32xf32>
    %cst_21 = arith.constant dense<0.000000e+00> : vector<8x32xf32>
    %33 = tpu.matmul %25, %3, %cst_21 {dimension_numbers = #tpu.dot_dimension_numbers<[1], [0], [0], [1], [0, 0, 1, 1], [], []>} : vector<8x32xf32>, vector<32x32xf32>, vector<8x32xf32> -> vector<8x32xf32>
    %34 = arith.addf %32, %33 : vector<8x32xf32>
    %35 = math.tanh %34 : vector<8x32xf32>
    %36 = vector.extract_strided_slice %9 {offsets = [24, 0], sizes = [8, 32], strides = [1, 1]} : vector<64x32xf32> to vector<8x32xf32>
    %cst_22 = arith.constant dense<0.000000e+00> : vector<8x32xf32>
    %37 = tpu.matmul %29, %2, %cst_22 {dimension_numbers = #tpu.dot_dimension_numbers<[1], [0], [0], [1], [0, 0, 1, 1], [], []>} : vector<8x32xf32>, vector<32x32xf32>, vector<8x32xf32> -> vector<8x32xf32>
    %38 = arith.addf %36, %37 : vector<8x32xf32>
    %39 = math.tanh %38 : vector<8x32xf32>
    %cst_23 = arith.constant dense<0.000000e+00> : vector<8x32xf32>
    %40 = tpu.matmul %29, %1, %cst_23 {dimension_numbers = #tpu.dot_dimension_numbers<[1], [0], [0], [1], [0, 0, 1, 1], [], []>} : vector<8x32xf32>, vector<32x32xf32>, vector<8x32xf32> -> vector<8x32xf32>
    %41 = vector.broadcast %5 : vector<1x32xf32> to vector<8x32xf32>
    %42 = arith.addf %40, %41 : vector<8x32xf32>
    %cst_24 = arith.constant dense<0.000000e+00> : vector<8x32xf32>
    %43 = tpu.matmul %35, %3, %cst_24 {dimension_numbers = #tpu.dot_dimension_numbers<[1], [0], [0], [1], [0, 0, 1, 1], [], []>} : vector<8x32xf32>, vector<32x32xf32>, vector<8x32xf32> -> vector<8x32xf32>
    %44 = arith.addf %42, %43 : vector<8x32xf32>
    %45 = math.tanh %44 : vector<8x32xf32>
    %46 = vector.extract_strided_slice %9 {offsets = [32, 0], sizes = [8, 32], strides = [1, 1]} : vector<64x32xf32> to vector<8x32xf32>
    %cst_25 = arith.constant dense<0.000000e+00> : vector<8x32xf32>
    %47 = tpu.matmul %39, %2, %cst_25 {dimension_numbers = #tpu.dot_dimension_numbers<[1], [0], [0], [1], [0, 0, 1, 1], [], []>} : vector<8x32xf32>, vector<32x32xf32>, vector<8x32xf32> -> vector<8x32xf32>
    %48 = arith.addf %46, %47 : vector<8x32xf32>
    %49 = math.tanh %48 : vector<8x32xf32>
    %cst_26 = arith.constant dense<0.000000e+00> : vector<8x32xf32>
    %50 = tpu.matmul %39, %1, %cst_26 {dimension_numbers = #tpu.dot_dimension_numbers<[1], [0], [0], [1], [0, 0, 1, 1], [], []>} : vector<8x32xf32>, vector<32x32xf32>, vector<8x32xf32> -> vector<8x32xf32>
    %51 = vector.broadcast %5 : vector<1x32xf32> to vector<8x32xf32>
    %52 = arith.addf %50, %51 : vector<8x32xf32>
    %cst_27 = arith.constant dense<0.000000e+00> : vector<8x32xf32>
    %53 = tpu.matmul %45, %3, %cst_27 {dimension_numbers = #tpu.dot_dimension_numbers<[1], [0], [0], [1], [0, 0, 1, 1], [], []>} : vector<8x32xf32>, vector<32x32xf32>, vector<8x32xf32> -> vector<8x32xf32>
    %54 = arith.addf %52, %53 : vector<8x32xf32>
    %55 = math.tanh %54 : vector<8x32xf32>
    %56 = vector.extract_strided_slice %9 {offsets = [40, 0], sizes = [8, 32], strides = [1, 1]} : vector<64x32xf32> to vector<8x32xf32>
    %cst_28 = arith.constant dense<0.000000e+00> : vector<8x32xf32>
    %57 = tpu.matmul %49, %2, %cst_28 {dimension_numbers = #tpu.dot_dimension_numbers<[1], [0], [0], [1], [0, 0, 1, 1], [], []>} : vector<8x32xf32>, vector<32x32xf32>, vector<8x32xf32> -> vector<8x32xf32>
    %58 = arith.addf %56, %57 : vector<8x32xf32>
    %59 = math.tanh %58 : vector<8x32xf32>
    %cst_29 = arith.constant dense<0.000000e+00> : vector<8x32xf32>
    %60 = tpu.matmul %49, %1, %cst_29 {dimension_numbers = #tpu.dot_dimension_numbers<[1], [0], [0], [1], [0, 0, 1, 1], [], []>} : vector<8x32xf32>, vector<32x32xf32>, vector<8x32xf32> -> vector<8x32xf32>
    %61 = vector.broadcast %5 : vector<1x32xf32> to vector<8x32xf32>
    %62 = arith.addf %60, %61 : vector<8x32xf32>
    %cst_30 = arith.constant dense<0.000000e+00> : vector<8x32xf32>
    %63 = tpu.matmul %55, %3, %cst_30 {dimension_numbers = #tpu.dot_dimension_numbers<[1], [0], [0], [1], [0, 0, 1, 1], [], []>} : vector<8x32xf32>, vector<32x32xf32>, vector<8x32xf32> -> vector<8x32xf32>
    %64 = arith.addf %62, %63 : vector<8x32xf32>
    %65 = math.tanh %64 : vector<8x32xf32>
    %66 = vector.extract_strided_slice %9 {offsets = [48, 0], sizes = [8, 32], strides = [1, 1]} : vector<64x32xf32> to vector<8x32xf32>
    %cst_31 = arith.constant dense<0.000000e+00> : vector<8x32xf32>
    %67 = tpu.matmul %59, %2, %cst_31 {dimension_numbers = #tpu.dot_dimension_numbers<[1], [0], [0], [1], [0, 0, 1, 1], [], []>} : vector<8x32xf32>, vector<32x32xf32>, vector<8x32xf32> -> vector<8x32xf32>
    %68 = arith.addf %66, %67 : vector<8x32xf32>
    %69 = math.tanh %68 : vector<8x32xf32>
    %cst_32 = arith.constant dense<0.000000e+00> : vector<8x32xf32>
    %70 = tpu.matmul %59, %1, %cst_32 {dimension_numbers = #tpu.dot_dimension_numbers<[1], [0], [0], [1], [0, 0, 1, 1], [], []>} : vector<8x32xf32>, vector<32x32xf32>, vector<8x32xf32> -> vector<8x32xf32>
    %71 = vector.broadcast %5 : vector<1x32xf32> to vector<8x32xf32>
    %72 = arith.addf %70, %71 : vector<8x32xf32>
    %cst_33 = arith.constant dense<0.000000e+00> : vector<8x32xf32>
    %73 = tpu.matmul %65, %3, %cst_33 {dimension_numbers = #tpu.dot_dimension_numbers<[1], [0], [0], [1], [0, 0, 1, 1], [], []>} : vector<8x32xf32>, vector<32x32xf32>, vector<8x32xf32> -> vector<8x32xf32>
    %74 = arith.addf %72, %73 : vector<8x32xf32>
    %75 = math.tanh %74 : vector<8x32xf32>
    %76 = vector.extract_strided_slice %9 {offsets = [56, 0], sizes = [8, 32], strides = [1, 1]} : vector<64x32xf32> to vector<8x32xf32>
    %cst_34 = arith.constant dense<0.000000e+00> : vector<8x32xf32>
    %77 = tpu.matmul %69, %2, %cst_34 {dimension_numbers = #tpu.dot_dimension_numbers<[1], [0], [0], [1], [0, 0, 1, 1], [], []>} : vector<8x32xf32>, vector<32x32xf32>, vector<8x32xf32> -> vector<8x32xf32>
    %78 = arith.addf %76, %77 : vector<8x32xf32>
    %79 = math.tanh %78 : vector<8x32xf32>
    %cst_35 = arith.constant dense<0.000000e+00> : vector<8x32xf32>
    %80 = tpu.matmul %69, %1, %cst_35 {dimension_numbers = #tpu.dot_dimension_numbers<[1], [0], [0], [1], [0, 0, 1, 1], [], []>} : vector<8x32xf32>, vector<32x32xf32>, vector<8x32xf32> -> vector<8x32xf32>
    %81 = vector.broadcast %5 : vector<1x32xf32> to vector<8x32xf32>
    %82 = arith.addf %80, %81 : vector<8x32xf32>
    %cst_36 = arith.constant dense<0.000000e+00> : vector<8x32xf32>
    %83 = tpu.matmul %75, %3, %cst_36 {dimension_numbers = #tpu.dot_dimension_numbers<[1], [0], [0], [1], [0, 0, 1, 1], [], []>} : vector<8x32xf32>, vector<32x32xf32>, vector<8x32xf32> -> vector<8x32xf32>
    %84 = arith.addf %82, %83 : vector<8x32xf32>
    %85 = math.tanh %84 : vector<8x32xf32>
    %cst_37 = arith.constant dense<0.000000e+00> : vector<8x32xf32>
    %86 = tpu.matmul %79, %1, %cst_37 {dimension_numbers = #tpu.dot_dimension_numbers<[1], [0], [0], [1], [0, 0, 1, 1], [], []>} : vector<8x32xf32>, vector<32x32xf32>, vector<8x32xf32> -> vector<8x32xf32>
    %87 = vector.broadcast %5 : vector<1x32xf32> to vector<8x32xf32>
    %88 = arith.addf %86, %87 : vector<8x32xf32>
    %cst_38 = arith.constant dense<0.000000e+00> : vector<8x32xf32>
    %89 = tpu.matmul %85, %3, %cst_38 {dimension_numbers = #tpu.dot_dimension_numbers<[1], [0], [0], [1], [0, 0, 1, 1], [], []>} : vector<8x32xf32>, vector<32x32xf32>, vector<8x32xf32> -> vector<8x32xf32>
    %90 = arith.addf %88, %89 : vector<8x32xf32>
    %91 = math.tanh %90 : vector<8x32xf32>
    %92 = tpu.concatenate %25, %35, %45, %55, %65, %75, %85, %91 in 0 : vector<8x32xf32>, vector<8x32xf32>, vector<8x32xf32>, vector<8x32xf32>, vector<8x32xf32>, vector<8x32xf32>, vector<8x32xf32>, vector<8x32xf32> -> vector<64x32xf32>
    %c0_39 = arith.constant 0 : index
    %c0_40 = arith.constant 0 : index
    %93 = vector.load %arg7[%c0_39, %c0_40] : memref<32x32xf32, #tpu.memory_space<vmem>>, vector<32x32xf32>
    %cst_41 = arith.constant dense<0.000000e+00> : vector<64x32xf32>
    %94 = tpu.matmul %92, %93, %cst_41 {dimension_numbers = #tpu.dot_dimension_numbers<[1], [0], [0], [1], [0, 0, 1, 1], [], []>} : vector<64x32xf32>, vector<32x32xf32>, vector<64x32xf32> -> vector<64x32xf32>
    %c0_42 = arith.constant 0 : index
    %c0_43 = arith.constant 0 : index
    %95 = vector.load %arg8[%c0_42, %c0_43] : memref<1x32xf32, #tpu.memory_space<vmem>>, vector<1x32xf32>
    %96 = vector.broadcast %95 : vector<1x32xf32> to vector<64x32xf32>
    %97 = arith.addf %94, %96 : vector<64x32xf32>
    %c0_44 = arith.constant 0 : index
    %c0_45 = arith.constant 0 : index
    %98 = vector.load %arg9[%c0_44, %c0_45] : memref<64x32xf32, #tpu.memory_space<vmem>>, vector<64x32xf32>
    tpu.vector_store %arg9[%c0_44, %c0_45], %97 {strides = array<i32>} : memref<64x32xf32, #tpu.memory_space<vmem>>, vector<64x32xf32>,
    return
  }
}

</mosaic_0001>

<bundles_post_ra>
// kernel: encoder_forward.1
= control target key start
LH: loop header
LB: loop body
LE: loop exit
PB: predicated region body
PF: predicated region fallthrough
CT: control target
= control target key end

     0   :  { %14 = vsyncpa [#allocation3], 0  ;;  %s2650_s30 = smov [#allocation2]   ;;  %s3175_s0 = inlined_call_operand.vmem [shape: f32[64,4], index: 0, kind: input, shape index: {}]   ;;  %s3176_s1 = inlined_call_operand.vmem [shape: f32[4,32], index: 1, kind: input, shape index: {}]   ;;  %s3177_s2 = inlined_call_operand.vmem [shape: f32[32,32], index: 2, kind: input, shape index: {}]   ;;  %s3178_s3 = inlined_call_operand.vmem [shape: f32[32,32], index: 3, kind: input, shape index: {}]   ;;  %s3179_s4 = inlined_call_operand.vmem [shape: f32[32,32], index: 4, kind: input, shape index: {}]   ;;  %s3180_s5 = inlined_call_operand.vmem [shape: f32[1,32], index: 5, kind: input, shape index: {}]   ;;  %s3181_s6 = inlined_call_operand.vmem [shape: f32[1,32], index: 6, kind: input, shape index: {}]   ;;  %s3182_s7 = inlined_call_operand.hbm [shape: f32[32,32], index: 7, kind: input, shape index: {}]   ;;  %s3183_s8 = inlined_call_operand.vmem [shape: f32[1,32], index: 8, kind: input, shape index: {}]   ;;  %s3184_s9 = inlined_call_operand.vmem [shape: f32[64,32], index: 9, kind: output, shape index: {}]  }
   0x1   :  { %s34_s10 = sshll.u32 %s2650_s30, 4  ;;  %s35_s10 = int_to_ptr.vmem [resolvable:$true] %s34_s10 }
   0x2   :  { %s2636_s11 = scalar_lea.vmem %s35_s10, 512  ;;  %p2641_p1 = scmp.lt.s32.totalorder %s35_s10, %s35_s10 }
   0x3   :  { %p2637_p0 = scmp.ne.s32.totalorder %s35_s10, %s2636_s11  ;;  %p2642_p2 = scmp.lt.s32.totalorder %s2636_s11, %s2636_s11 }
   0x5   :  { %p2643_p3 = por %p2642_p2, %p2641_p1 }
   0x7   :  { %p2644_p4 = pnand %p2643_p3, %p2637_p0 }
   0x9   :  { %2647 = shalt.err (!%p2644_p4)
}
   0xa   :  { %s2651_s12 = smov 128   ;;  %s2652_s13 = smov 8  }
   0xb   :  { %40 = dma.hbm_to_vmem [thread:$0]  %s3182_s7, 512, %s35_s10, [#allocation3], %s2651_s12, %s2651_s12, %s2652_s13  }
   0xc   :  { %2648 = dma.done.wait [#allocation3], 512  }
   0xd   :  { %2649 = vsyncadd [#allocation3], 4294966784  ;;  %vm100_vm0 = vcmask 1043456   ;;  %vm75_vm1 = vcmask 31744   ;;  %v46_v0 = vld [vmem:[%s3176_s1] sm:$0xf] }
   0xe   :  { %v65_v1 = vld [vmem:[%s3175_s0 + $0x20] sm:$0xff]  ;;  %v66_v2 = vld [vmem:[%s3175_s0 + $0x28] sm:$0xff]  ;;  %2589 = vmatprep.subr.msk.mxu1 %vm100_vm0, %v46_v0  ;;  %v2722_v3 = vld [vmem:[%s3178_s3 + $0x18] sm:$0xff]  ;;  %2291 = vmatprep.subr.msk.mxu0 %vm100_vm0, %v46_v0  ;;  %v2653_v5 = vmov 0.0   ;;  %vm2654_vm2 = vmmov 0   ;;  %vm209_vm3 = vcmask 261120  }
   0xf   :  { %2299 = vmatprep.mubr.msk.f32.mxu1 %vm75_vm1, %v65_v1  ;;  %2590 = vmatpush3.msk.msra.mxu1 %vm100_vm0, %v46_v0  ;;  %v61_v4 = vld [vmem:[%s3175_s0] sm:$0xff]  ;;  %v62_v6 = vld [vmem:[%s3175_s0 + $0x8] sm:$0xff]  ;;  %v67_v7 = vld [vmem:[%s3175_s0 + $0x30] sm:$0xff] }
  0x10   :  { %2300 = vmatmul.mubr.msk.f32.vlgmr.msra.gmra.mxu1 %vm75_vm1, %v66_v2  ;;  %2305 = vmatprep.subr.mxu1 %v2653_v5  ;;  %v2742_v8 = vld [vmem:[%s3178_s3 + $0x10] sm:$0xff]  ;;  %v68_v9 = vld [vmem:[%s3175_s0 + $0x38] sm:$0xff]  ;;  %v2754_v10 = vld [vmem:[%s3178_s3 + $0x8] sm:$0xff] }
  0x11   :  { %2306 = vmatpush3.msra.mxu1 %v2722_v3  ;;  %2292 = vmatpush3.msk.msra.mxu0 %vm100_vm0, %v46_v0  ;;  %v2763_v11 = vld [vmem:[%s3178_s3] sm:$0xff]  ;;  %v2785_v12 = vld [vmem:[%s3177_s2 + $0x18] sm:$0xff]  ;;  %v63_v13 = vld [vmem:[%s3175_s0 + $0x10] sm:$0xff] }
  0x12   :  { %2293 = vmatprep.mubr.msk.f32.mxu0 %vm75_vm1, %v61_v4  ;;  %2307 = vmatprep.subr.mxu1 %v2653_v5  ;;  %v2793_v14 = vld [vmem:[%s3177_s2 + $0x10] sm:$0xff]  ;;  %v64_v15 = vld [vmem:[%s3175_s0 + $0x18] sm:$0xff]  ;;  %v2805_v16 = vld [vmem:[%s3177_s2 + $0x8] sm:$0xff] }
  0x13   :  { %2294 = vmatmul.mubr.msk.f32.vlgmr.msra.gmra.mxu0 %vm75_vm1, %v62_v6  ;;  %2302 = vmatprep.mubr.msk.f32.mxu1 %vm75_vm1, %v67_v7  ;;  %v2814_v17 = vld [vmem:[%s3177_s2] sm:$0xff]  ;;  %v2837_v29 = vld [vmem:[%s3179_s4 + $0x18] sm:$0xff]  ;;  %v2844_v31 = vld [vmem:[%s3179_s4 + $0x10] sm:$0xff] }
  0x14   :  { %2308 = vmatpush3.msra.mxu1 %v2742_v8  ;;  %2327 = vmatprep.subr.mxu0 %v2653_v5  ;;  %v2829_v23 = vld [vmem:[%s3180_s5] ss:$0 sm:$0xff]  ;;  %v2853_v32 = vld [vmem:[%s3179_s4 + $0x8] sm:$0xff] }
  0x15   :  { %2303 = vmatmul.mubr.msk.f32.gmra.mxu1 %vm75_vm1, %v68_v9  ;;  %2309 = vmatprep.subr.mxu1 %v2653_v5  ;;  %v2862_v33 = vld [vmem:[%s3179_s4] sm:$0xff] }
  0x16   :  { %2310 = vmatpush3.msra.mxu1 %v2754_v10  ;;  %2313 = vmatprep.mubr.msk.f32.mxu1 %vm2654_vm2, %v2653_v5  ;;  %v2893_v42 = vld [vmem:[%s3181_s6] ss:$0 sm:$0xff] }
  0x17   :  { %2311 = vmatprep.subr.mxu1 %v2653_v5  ;;  %2328 = vmatpush3.msra.mxu0 %v2785_v12 }
  0x18   :  { %2312 = vmatpush3.msra.mxu1 %v2763_v11  ;;  %2296 = vmatprep.mubr.msk.f32.mxu0 %vm75_vm1, %v63_v13 }
  0x19   :  { %2314 = vmatmul.mubr.f32.vlgmr.msra.gmra.mxu1 %v2653_v5  ;;  %2316 = vmatprep.subr.mxu1 %v2653_v5 }
  0x1a   :  { %2317 = vmatpush3.msra.mxu1 %v2722_v3  ;;  %2324 = vmatprep.mubr.msk.f32.mxu1 %vm2654_vm2, %v2653_v5 }
  0x1b   :  { %2318 = vmatprep.subr.mxu1 %v2653_v5  ;;  %2329 = vmatprep.subr.mxu0 %v2653_v5 }
  0x1c   :  { %2319 = vmatpush3.msra.mxu1 %v2742_v8  ;;  %2297 = vmatmul.mubr.msk.f32.gmra.mxu0 %vm75_vm1, %v64_v15 }
  0x1d   :  { %2320 = vmatprep.subr.mxu1 %v2653_v5  ;;  %2330 = vmatpush3.msra.mxu0 %v2793_v14 }
  0x1e   :  { %2321 = vmatpush3.msra.mxu1 %v2754_v10  ;;  %2335 = vmatprep.mubr.msk.f32.mxu0 %vm2654_vm2, %v2653_v5 }
  0x1f   :  { %2322 = vmatprep.subr.mxu1 %v2653_v5  ;;  %2331 = vmatprep.subr.mxu0 %v2653_v5 }
  0x20   :  { %2323 = vmatpush3.msra.mxu1 %v2763_v11  ;;  %2332 = vmatpush3.msra.mxu0 %v2805_v16 }
  0x21   :  { %2338 = vmatprep.subr.mxu1 %v2653_v5  ;;  %2333 = vmatprep.subr.mxu0 %v2653_v5 }
  0x22   :  { %2334 = vmatpush3.msra.mxu0 %v2814_v17 }
  0x23   :  { %2349 = vmatprep.subr.mxu0 %v2653_v5 }
  0xd0   :  { %v2820_v18 = vpop.f32.mrf.mxu1 }
  0xd2   :  { %v2822_v19 = vpop.f32.mrf.mxu1 }
  0xd3   :  { %v2295_v20 = vpop.f32.mrf.mxu0 }
  0xd4   :  { %v176_v36 = vadd.f32 %v2295_v20, %v2829_v23  ;;  %v191_v20 = vadd.f32 %v2829_v23, %v2822_v19 }
  0xd5   :  { %v2824_v21 = vpop.f32.mrf.mxu1  ;;  %v170_v22 = vpop.f32.mrf.mxu0 }
  0xd6   :  { %v171_v25 = vadd.f32 %v2829_v23, %v170_v22 }
  0xd7   :  { %v2831_v24 = vpop.f32.mrf.mxu1 }
  0xd9   :  { %v279_v26 = vpop.f32.mrf.mxu1 }
  0xda   :  { %v283_v27 = vadd.f32 %v279_v26, %v171_v25 }
  0xdb   :  { %v2315_v28 = vpop.f32.mrf.mxu1 }
  0xdc   :  { %2596 = vtanh.f32 %v283_v27  ;;  %v2887_v34 = vpop.f32.mrf.mxu0 }
  0xdd   :  { %v186_v61 = vadd.f32 %v2887_v34, %v2829_v23 }
  0xde   :  { %v180_v35 = vpop.f32.mrf.mxu0 }
  0xdf   :  { %v181_v49 = vadd.f32 %v2829_v23, %v180_v35 }
  0xe9   :  { %v2597_v30 = vpop.eup %2596 }
  0xea   :  { %2325 = vmatmul.mubr.msk.f32.vlgmr.msra.gmra.mxu1 %vm209_vm3, %v2597_v30  ;;  %2336 = vmatmul.mubr.msk.f32.vlgmr.msra.gmra.mxu0 %vm209_vm3, %v2597_v30 }
  0xeb   :  { %2339 = vmatpush3.msra.mxu1 %v2837_v29  ;;  %2346 = vmatprep.mubr.msk.f32.mxu1 %vm2654_vm2, %v2653_v5 }
  0xec   :  { %2340 = vmatprep.subr.mxu1 %v2653_v5  ;;  %2350 = vmatpush3.msra.mxu0 %v2722_v3 }
  0xed   :  { %2341 = vmatpush3.msra.mxu1 %v2844_v31  ;;  %2351 = vmatprep.subr.mxu0 %v2653_v5 }
  0xee   :  { %2342 = vmatprep.subr.mxu1 %v2653_v5  ;;  %2352 = vmatpush3.msra.mxu0 %v2742_v8 }
  0xef   :  { %2343 = vmatpush3.msra.mxu1 %v2853_v32  ;;  %2353 = vmatprep.subr.mxu0 %v2653_v5 }
  0xf0   :  { %2344 = vmatprep.subr.mxu1 %v2653_v5  ;;  %2354 = vmatpush3.msra.mxu0 %v2754_v10 }
  0xf1   :  { %2345 = vmatpush3.msra.mxu1 %v2862_v33  ;;  %2355 = vmatprep.subr.mxu0 %v2653_v5 }
  0xf2   :  { %2347 = vmatmul.mubr.f32.vlgmr.msra.gmra.mxu1 %v2653_v5  ;;  %2360 = vmatprep.subr.mxu1 %v2653_v5 }
  0xf3   :  { %2361 = vmatpush3.msra.mxu1 %v2785_v12  ;;  %2356 = vmatpush3.msra.mxu0 %v2763_v11 }
  0xf4   :  { %2362 = vmatprep.subr.mxu1 %v2653_v5  ;;  %2357 = vmatprep.mubr.msk.f32.mxu0 %vm2654_vm2, %v2653_v5 }
  0xf5   :  { %2363 = vmatpush3.msra.mxu1 %v2793_v14  ;;  %2368 = vmatprep.mubr.msk.f32.mxu1 %vm2654_vm2, %v2653_v5 }
  0xf6   :  { %2364 = vmatprep.subr.mxu1 %v2653_v5  ;;  %2371 = vmatprep.subr.mxu0 %v2653_v5 }
  0xf7   :  { %2365 = vmatpush3.msra.mxu1 %v2805_v16 }
  0xf8   :  { %2366 = vmatprep.subr.mxu1 %v2653_v5 }
  0xf9   :  { %2367 = vmatpush3.msra.mxu1 %v2814_v17 }
  0xfa   :  { %2382 = vmatprep.subr.mxu1 %v2653_v5 }
 0x1aa   :  { %v354_v37 = vpop.f32.mrf.mxu1  ;;  %v432_v38 = vpop.f32.mrf.mxu0 }
 0x1ab   :  { %v358_v39 = vadd.f32 %v354_v37, %v176_v36  ;;  %v433_v43 = vadd.f32 %v2893_v42, %v432_v38  ;;  %v196_v38 = vadd.f32 %v2820_v18, %v2829_v23 }
 0x1ac   :  { %v2326_v40 = vpop.f32.mrf.mxu1  ;;  %v2337_v41 = vpop.f32.mrf.mxu0 }
 0x1ad   :  { %2598 = vtanh.f32 %v358_v39 }
 0x1b2   :  { %v502_v44 = vpop.f32.mrf.mxu1 }
 0x1b3   :  { %v506_v45 = vadd.f32 %v502_v44, %v433_v43 }
 0x1b4   :  { %v2348_v46 = vpop.f32.mrf.mxu1 }
 0x1b5   :  { %2600 = vtanh.f32 %v506_v45 }
 0x1ba   :  { %v2599_v47 = vpop.eup %2598 }
 0x1bb   :  { %2358 = vmatmul.mubr.msk.f32.vlgmr.msra.gmra.mxu0 %vm209_vm3, %v2599_v47  ;;  %2369 = vmatmul.mubr.msk.f32.vlgmr.msra.gmra.mxu1 %vm209_vm3, %v2599_v47 }
 0x1bc   :  { %2372 = vmatpush3.msra.mxu0 %v2837_v29  ;;  %2379 = vmatprep.mubr.msk.f32.mxu0 %vm2654_vm2, %v2653_v5 }
 0x1bd   :  { %2373 = vmatprep.subr.mxu0 %v2653_v5  ;;  %2383 = vmatpush3.msra.mxu1 %v2722_v3 }
 0x1be   :  { %2374 = vmatpush3.msra.mxu0 %v2844_v31  ;;  %2384 = vmatprep.subr.mxu1 %v2653_v5 }
 0x1bf   :  { %2375 = vmatprep.subr.mxu0 %v2653_v5  ;;  %2385 = vmatpush3.msra.mxu1 %v2742_v8 }
 0x1c0   :  { %2376 = vmatpush3.msra.mxu0 %v2853_v32  ;;  %2386 = vmatprep.subr.mxu1 %v2653_v5 }
 0x1c1   :  { %2377 = vmatprep.subr.mxu0 %v2653_v5  ;;  %2387 = vmatpush3.msra.mxu1 %v2754_v10 }
 0x1c2   :  { %v2911_v48 = vpop.eup %2600  ;;  %2378 = vmatpush3.msra.mxu0 %v2862_v33  ;;  %2388 = vmatprep.subr.mxu1 %v2653_v5 }
 0x1c3   :  { %2380 = vmatmul.mubr.msk.f32.vlgmr.msra.gmra.mxu0 %vm209_vm3, %v2911_v48  ;;  %2393 = vmatprep.subr.mxu0 %v2653_v5 }
 0x1c4   :  { %2394 = vmatpush3.msra.mxu0 %v2785_v12  ;;  %2389 = vmatpush3.msra.mxu1 %v2763_v11 }
 0x1c5   :  { %2395 = vmatprep.subr.mxu0 %v2653_v5  ;;  %2390 = vmatprep.mubr.msk.f32.mxu1 %vm2654_vm2, %v2653_v5 }
 0x1c6   :  { %2396 = vmatpush3.msra.mxu0 %v2793_v14  ;;  %2401 = vmatprep.mubr.msk.f32.mxu0 %vm2654_vm2, %v2653_v5 }
 0x1c7   :  { %2397 = vmatprep.subr.mxu0 %v2653_v5  ;;  %2404 = vmatprep.subr.mxu1 %v2653_v5 }
 0x1c8   :  { %2398 = vmatpush3.msra.mxu0 %v2805_v16 }
 0x1c9   :  { %2399 = vmatprep.subr.mxu0 %v2653_v5 }
 0x1ca   :  { %2400 = vmatpush3.msra.mxu0 %v2814_v17 }
 0x1cb   :  { %2415 = vmatprep.subr.mxu0 %v2653_v5 }
 0x27b   :  { %v577_v50 = vpop.f32.mrf.mxu0  ;;  %v649_v51 = vpop.f32.mrf.mxu1 }
 0x27c   :  { %v581_v52 = vadd.f32 %v577_v50, %v181_v49  ;;  %v650_v55 = vadd.f32 %v2893_v42, %v649_v51 }
 0x27d   :  { %v2359_v53 = vpop.f32.mrf.mxu0  ;;  %v2370_v54 = vpop.f32.mrf.mxu1 }
 0x27e   :  { %2602 = vtanh.f32 %v581_v52 }
 0x283   :  { %v722_v56 = vpop.f32.mrf.mxu0 }
 0x284   :  { %v726_v57 = vadd.f32 %v722_v56, %v650_v55 }
 0x285   :  { %v2381_v58 = vpop.f32.mrf.mxu0 }
 0x286   :  { %2604 = vtanh.f32 %v726_v57 }
 0x28b   :  { %v2603_v59 = vpop.eup %2602 }
 0x28c   :  { %2391 = vmatmul.mubr.msk.f32.vlgmr.msra.gmra.mxu1 %vm209_vm3, %v2603_v59  ;;  %2402 = vmatmul.mubr.msk.f32.vlgmr.msra.gmra.mxu0 %vm209_vm3, %v2603_v59 }
 0x28d   :  { %2405 = vmatpush3.msra.mxu1 %v2837_v29  ;;  %2412 = vmatprep.mubr.msk.f32.mxu1 %vm2654_vm2, %v2653_v5 }
 0x28e   :  { %2406 = vmatprep.subr.mxu1 %v2653_v5  ;;  %2416 = vmatpush3.msra.mxu0 %v2722_v3 }
 0x28f   :  { %2407 = vmatpush3.msra.mxu1 %v2844_v31  ;;  %2417 = vmatprep.subr.mxu0 %v2653_v5 }
 0x290   :  { %2408 = vmatprep.subr.mxu1 %v2653_v5  ;;  %2418 = vmatpush3.msra.mxu0 %v2742_v8 }
 0x291   :  { %2409 = vmatpush3.msra.mxu1 %v2853_v32  ;;  %2419 = vmatprep.subr.mxu0 %v2653_v5 }
 0x292   :  { %2410 = vmatprep.subr.mxu1 %v2653_v5  ;;  %2420 = vmatpush3.msra.mxu0 %v2754_v10 }
 0x293   :  { %v2949_v60 = vpop.eup %2604  ;;  %2411 = vmatpush3.msra.mxu1 %v2862_v33  ;;  %2421 = vmatprep.subr.mxu0 %v2653_v5 }
 0x294   :  { %2413 = vmatmul.mubr.msk.f32.vlgmr.msra.gmra.mxu1 %vm209_vm3, %v2949_v60  ;;  %2426 = vmatprep.subr.mxu1 %v2653_v5 }
 0x295   :  { %2427 = vmatpush3.msra.mxu1 %v2785_v12  ;;  %2422 = vmatpush3.msra.mxu0 %v2763_v11 }
 0x296   :  { %2428 = vmatprep.subr.mxu1 %v2653_v5  ;;  %2423 = vmatprep.mubr.msk.f32.mxu0 %vm2654_vm2, %v2653_v5 }
 0x297   :  { %2429 = vmatpush3.msra.mxu1 %v2793_v14  ;;  %2434 = vmatprep.mubr.msk.f32.mxu1 %vm2654_vm2, %v2653_v5 }
 0x298   :  { %2430 = vmatprep.subr.mxu1 %v2653_v5  ;;  %2437 = vmatprep.subr.mxu0 %v2653_v5 }
 0x299   :  { %2431 = vmatpush3.msra.mxu1 %v2805_v16 }
 0x29a   :  { %2432 = vmatprep.subr.mxu1 %v2653_v5 }
 0x29b   :  { %2433 = vmatpush3.msra.mxu1 %v2814_v17 }
 0x29c   :  { %2448 = vmatprep.subr.mxu1 %v2653_v5 }
 0x34c   :  { %v797_v62 = vpop.f32.mrf.mxu1  ;;  %v869_v63 = vpop.f32.mrf.mxu0 }
 0x34d   :  { %v801_v0 = vadd.f32 %v797_v62, %v186_v61  ;;  %v870_v4 = vadd.f32 %v2893_v42, %v869_v63  ;;  %v1978_v63 = vld [vmem:[#allocation2 + $0x10] sm:$0xff] }
 0x34e   :  { %v2392_v1 = vpop.f32.mrf.mxu1  ;;  %v2403_v2 = vpop.f32.mrf.mxu0 }
 0x34f   :  { %2606 = vtanh.f32 %v801_v0  ;;  %v2141_v1 = vld [vmem:[%s3183_s8] ss:$0 sm:$0xff] }
 0x354   :  { %v942_v6 = vpop.f32.mrf.mxu1 }
 0x355   :  { %v946_v7 = vadd.f32 %v942_v6, %v870_v4 }
 0x356   :  { %v2414_v9 = vpop.f32.mrf.mxu1 }
 0x357   :  { %2608 = vtanh.f32 %v946_v7 }
 0x35c   :  { %v2607_v13 = vpop.eup %2606 }
 0x35d   :  { %2424 = vmatmul.mubr.msk.f32.vlgmr.msra.gmra.mxu0 %vm209_vm3, %v2607_v13  ;;  %2435 = vmatmul.mubr.msk.f32.vlgmr.msra.gmra.mxu1 %vm209_vm3, %v2607_v13 }
 0x35e   :  { %2438 = vmatpush3.msra.mxu0 %v2837_v29  ;;  %2445 = vmatprep.mubr.msk.f32.mxu0 %vm2654_vm2, %v2653_v5 }
 0x35f   :  { %2439 = vmatprep.subr.mxu0 %v2653_v5  ;;  %2449 = vmatpush3.msra.mxu1 %v2722_v3 }
 0x360   :  { %2440 = vmatpush3.msra.mxu0 %v2844_v31  ;;  %2450 = vmatprep.subr.mxu1 %v2653_v5 }
 0x361   :  { %2441 = vmatprep.subr.mxu0 %v2653_v5  ;;  %2451 = vmatpush3.msra.mxu1 %v2742_v8 }
 0x362   :  { %2442 = vmatpush3.msra.mxu0 %v2853_v32  ;;  %2452 = vmatprep.subr.mxu1 %v2653_v5 }
 0x363   :  { %2443 = vmatprep.subr.mxu0 %v2653_v5  ;;  %2453 = vmatpush3.msra.mxu1 %v2754_v10 }
 0x364   :  { %v2988_v15 = vpop.eup %2608  ;;  %2444 = vmatpush3.msra.mxu0 %v2862_v33  ;;  %2454 = vmatprep.subr.mxu1 %v2653_v5 }
 0x365   :  { %2446 = vmatmul.mubr.msk.f32.vlgmr.msra.gmra.mxu0 %vm209_vm3, %v2988_v15  ;;  %2459 = vmatprep.subr.mxu0 %v2653_v5 }
 0x366   :  { %2460 = vmatpush3.msra.mxu0 %v2785_v12  ;;  %2455 = vmatpush3.msra.mxu1 %v2763_v11 }
 0x367   :  { %2461 = vmatprep.subr.mxu0 %v2653_v5  ;;  %2456 = vmatprep.mubr.msk.f32.mxu1 %vm2654_vm2, %v2653_v5 }
 0x368   :  { %2462 = vmatpush3.msra.mxu0 %v2793_v14  ;;  %2467 = vmatprep.mubr.msk.f32.mxu0 %vm2654_vm2, %v2653_v5 }
 0x369   :  { %2463 = vmatprep.subr.mxu0 %v2653_v5  ;;  %2470 = vmatprep.subr.mxu1 %v2653_v5 }
 0x36a   :  { %2464 = vmatpush3.msra.mxu0 %v2805_v16 }
 0x36b   :  { %2465 = vmatprep.subr.mxu0 %v2653_v5 }
 0x36c   :  { %2466 = vmatpush3.msra.mxu0 %v2814_v17 }
 0x36d   :  { %2481 = vmatprep.subr.mxu0 %v2653_v5 }
 0x41d   :  { %v1017_v22 = vpop.f32.mrf.mxu0  ;;  %v1089_v25 = vpop.f32.mrf.mxu1 }
 0x41e   :  { %v1021_v26 = vadd.f32 %v1017_v22, %v191_v20  ;;  %v1090_v30 = vadd.f32 %v2893_v42, %v1089_v25 }
 0x41f   :  { %v2425_v27 = vpop.f32.mrf.mxu0  ;;  %v2436_v28 = vpop.f32.mrf.mxu1 }
 0x420   :  { %2610 = vtanh.f32 %v1021_v26 }
 0x425   :  { %v1162_v34 = vpop.f32.mrf.mxu0 }
 0x426   :  { %v1166_v35 = vadd.f32 %v1162_v34, %v1090_v30 }
 0x427   :  { %v2447_v36 = vpop.f32.mrf.mxu0 }
 0x428   :  { %2612 = vtanh.f32 %v1166_v35 }
 0x42d   :  { %v2611_v37 = vpop.eup %2610 }
 0x42e   :  { %2457 = vmatmul.mubr.msk.f32.vlgmr.msra.gmra.mxu1 %vm209_vm3, %v2611_v37  ;;  %2468 = vmatmul.mubr.msk.f32.vlgmr.msra.gmra.mxu0 %vm209_vm3, %v2611_v37 }
 0x42f   :  { %2471 = vmatpush3.msra.mxu1 %v2837_v29  ;;  %2478 = vmatprep.mubr.msk.f32.mxu1 %vm2654_vm2, %v2653_v5 }
 0x430   :  { %2472 = vmatprep.subr.mxu1 %v2653_v5  ;;  %2482 = vmatpush3.msra.mxu0 %v2722_v3 }
 0x431   :  { %2473 = vmatpush3.msra.mxu1 %v2844_v31  ;;  %2483 = vmatprep.subr.mxu0 %v2653_v5 }
 0x432   :  { %2474 = vmatprep.subr.mxu1 %v2653_v5  ;;  %2484 = vmatpush3.msra.mxu0 %v2742_v8 }
 0x433   :  { %2475 = vmatpush3.msra.mxu1 %v2853_v32  ;;  %2485 = vmatprep.subr.mxu0 %v2653_v5 }
 0x434   :  { %2476 = vmatprep.subr.mxu1 %v2653_v5  ;;  %2486 = vmatpush3.msra.mxu0 %v2754_v10 }
 0x435   :  { %v3027_v19 = vpop.eup %2612  ;;  %2477 = vmatpush3.msra.mxu1 %v2862_v33  ;;  %2487 = vmatprep.subr.mxu0 %v2653_v5 }
 0x436   :  { %2479 = vmatmul.mubr.msk.f32.vlgmr.msra.gmra.mxu1 %vm209_vm3, %v3027_v19  ;;  %2492 = vmatprep.subr.mxu1 %v2653_v5 }
 0x437   :  { %2493 = vmatpush3.msra.mxu1 %v2785_v12  ;;  %2488 = vmatpush3.msra.mxu0 %v2763_v11 }
 0x438   :  { %2494 = vmatprep.subr.mxu1 %v2653_v5  ;;  %2489 = vmatprep.mubr.msk.f32.mxu0 %vm2654_vm2, %v2653_v5 }
 0x439   :  { %2495 = vmatpush3.msra.mxu1 %v2793_v14  ;;  %2500 = vmatprep.mubr.msk.f32.mxu1 %vm2654_vm2, %v2653_v5 }
 0x43a   :  { %2496 = vmatprep.subr.mxu1 %v2653_v5  ;;  %2503 = vmatprep.subr.mxu0 %v2653_v5 }
 0x43b   :  { %2497 = vmatpush3.msra.mxu1 %v2805_v16 }
 0x43c   :  { %2498 = vmatprep.subr.mxu1 %v2653_v5 }
 0x43d   :  { %2499 = vmatpush3.msra.mxu1 %v2814_v17 }
 0x43e   :  { %2514 = vmatprep.subr.mxu1 %v2653_v5 }
 0x4ee   :  { %v1237_v39 = vpop.f32.mrf.mxu1  ;;  %v1309_v40 = vpop.f32.mrf.mxu0 }
 0x4ef   :  { %v1241_v41 = vadd.f32 %v1237_v39, %v196_v38  ;;  %v1310_v45 = vadd.f32 %v2893_v42, %v1309_v40 }
 0x4f0   :  { %v2458_v43 = vpop.f32.mrf.mxu1  ;;  %v2469_v44 = vpop.f32.mrf.mxu0 }
 0x4f1   :  { %2614 = vtanh.f32 %v1241_v41 }
 0x4f6   :  { %v1382_v46 = vpop.f32.mrf.mxu1 }
 0x4f7   :  { %v1386_v47 = vadd.f32 %v1382_v46, %v1310_v45 }
 0x4f8   :  { %v2480_v49 = vpop.f32.mrf.mxu1 }
 0x4f9   :  { %2616 = vtanh.f32 %v1386_v47 }
 0x4fe   :  { %v2615_v50 = vpop.eup %2614 }
 0x4ff   :  { %2490 = vmatmul.mubr.msk.f32.vlgmr.msra.gmra.mxu0 %vm209_vm3, %v2615_v50  ;;  %2501 = vmatmul.mubr.msk.f32.vlgmr.msra.gmra.mxu1 %vm209_vm3, %v2615_v50 }
 0x500   :  { %2504 = vmatpush3.msra.mxu0 %v2837_v29  ;;  %2511 = vmatprep.mubr.msk.f32.mxu0 %vm2654_vm2, %v2653_v5 }
 0x501   :  { %2505 = vmatprep.subr.mxu0 %v2653_v5  ;;  %2515 = vmatpush3.msra.mxu1 %v2722_v3  ;;  %v201_v3 = vadd.f32 %v2829_v23, %v2831_v24 }
 0x502   :  { %2506 = vmatpush3.msra.mxu0 %v2844_v31  ;;  %2516 = vmatprep.subr.mxu1 %v2653_v5 }
 0x503   :  { %2507 = vmatprep.subr.mxu0 %v2653_v5  ;;  %2517 = vmatpush3.msra.mxu1 %v2742_v8 }
 0x504   :  { %2508 = vmatpush3.msra.mxu0 %v2853_v32  ;;  %2518 = vmatprep.subr.mxu1 %v2653_v5 }
 0x505   :  { %2509 = vmatprep.subr.mxu0 %v2653_v5  ;;  %2519 = vmatpush3.msra.mxu1 %v2754_v10 }
 0x506   :  { %v3066_v18 = vpop.eup %2616  ;;  %2510 = vmatpush3.msra.mxu0 %v2862_v33  ;;  %2520 = vmatprep.subr.mxu1 %v2653_v5 }
 0x507   :  { %2512 = vmatmul.mubr.msk.f32.vlgmr.msra.gmra.mxu0 %vm209_vm3, %v3066_v18  ;;  %2525 = vmatprep.subr.mxu0 %v2653_v5 }
 0x508   :  { %2526 = vmatpush3.msra.mxu0 %v2785_v12  ;;  %2521 = vmatpush3.msra.mxu1 %v2763_v11 }
 0x509   :  { %2527 = vmatprep.subr.mxu0 %v2653_v5  ;;  %2522 = vmatprep.mubr.msk.f32.mxu1 %vm2654_vm2, %v2653_v5 }
 0x50a   :  { %2528 = vmatpush3.msra.mxu0 %v2793_v14  ;;  %2533 = vmatprep.mubr.msk.f32.mxu0 %vm2654_vm2, %v2653_v5 }
 0x50b   :  { %2529 = vmatprep.subr.mxu0 %v2653_v5  ;;  %2536 = vmatprep.subr.mxu1 %v2653_v5 }
 0x50c   :  { %2530 = vmatpush3.msra.mxu0 %v2805_v16 }
 0x50d   :  { %2531 = vmatprep.subr.mxu0 %v2653_v5 }
 0x50e   :  { %2532 = vmatpush3.msra.mxu0 %v2814_v17 }
 0x50f   :  { %2547 = vmatprep.subr.mxu0 %v2653_v5 }
 0x5bf   :  { %v1457_v8 = vpop.f32.mrf.mxu0  ;;  %v1529_v10 = vpop.f32.mrf.mxu1 }
 0x5c0   :  { %v1461_v11 = vadd.f32 %v1457_v8, %v201_v3  ;;  %v1530_v53 = vadd.f32 %v2893_v42, %v1529_v10 }
 0x5c1   :  { %v2491_v51 = vpop.f32.mrf.mxu0  ;;  %v2502_v52 = vpop.f32.mrf.mxu1 }
 0x5c2   :  { %2618 = vtanh.f32 %v1461_v11 }
 0x5c7   :  { %v1602_v54 = vpop.f32.mrf.mxu0 }
 0x5c8   :  { %v1606_v55 = vadd.f32 %v1602_v54, %v1530_v53 }
 0x5c9   :  { %v2513_v56 = vpop.f32.mrf.mxu0 }
 0x5ca   :  { %2620 = vtanh.f32 %v1606_v55 }
 0x5cf   :  { %v2619_v57 = vpop.eup %2618 }
 0x5d0   :  { %2523 = vmatmul.mubr.msk.f32.vlgmr.msra.gmra.mxu1 %vm209_vm3, %v2619_v57  ;;  %2534 = vmatmul.mubr.msk.f32.vlgmr.msra.gmra.mxu0 %vm209_vm3, %v2619_v57 }
 0x5d1   :  { %2537 = vmatpush3.msra.mxu1 %v2837_v29  ;;  %2544 = vmatprep.mubr.msk.f32.mxu1 %vm2654_vm2, %v2653_v5 }
 0x5d2   :  { %2538 = vmatprep.subr.mxu1 %v2653_v5  ;;  %2548 = vmatpush3.msra.mxu0 %v2785_v12  ;;  %v1979_v12 = vld [vmem:[#allocation2 + $0x18] sm:$0xff] }
 0x5d3   :  { %2539 = vmatpush3.msra.mxu1 %v2844_v31  ;;  %2549 = vmatprep.subr.mxu0 %v2653_v5 }
 0x5d4   :  { %2540 = vmatprep.subr.mxu1 %v2653_v5  ;;  %2550 = vmatpush3.msra.mxu0 %v2793_v14  ;;  %v206_v14 = vadd.f32 %v2824_v21, %v2829_v23  ;;  %v1977_v21 = vld [vmem:[#allocation2 + $0x8] sm:$0xff]  ;;  %v1976_v23 = vld [vmem:[#allocation2] sm:$0xff] }
 0x5d5   :  { %2541 = vmatpush3.msra.mxu1 %v2853_v32  ;;  %2551 = vmatprep.subr.mxu0 %v2653_v5 }
 0x5d6   :  { %2542 = vmatprep.subr.mxu1 %v2653_v5  ;;  %2552 = vmatpush3.msra.mxu0 %v2805_v16 }
 0x5d7   :  { %v2621_v24 = vpop.eup %2620  ;;  %2543 = vmatpush3.msra.mxu1 %v2862_v33  ;;  %2553 = vmatprep.subr.mxu0 %v2653_v5 }
 0x5d8   :  { %2545 = vmatmul.mubr.msk.f32.vlgmr.msra.gmra.mxu1 %vm209_vm3, %v2621_v24  ;;  %2554 = vmatpush3.msra.mxu0 %v2814_v17 }
 0x5d9   :  { %2555 = vmatprep.mubr.msk.f32.mxu0 %vm2654_vm2, %v2653_v5  ;;  %2558 = vmatprep.subr.mxu1 %v2653_v5 }
 0x5da   :  { %2559 = vmatpush3.msra.mxu1 %v2837_v29  ;;  %2566 = vmatprep.mubr.msk.f32.mxu1 %vm2654_vm2, %v2653_v5 }
 0x5db   :  { %2560 = vmatprep.subr.mxu1 %v2653_v5  ;;  %2569 = vmatprep.subr.mxu0 %v1979_v12 }
 0x5dc   :  { %2561 = vmatpush3.msra.mxu1 %v2844_v31 }
 0x5dd   :  { %2562 = vmatprep.subr.mxu1 %v2653_v5 }
 0x5de   :  { %2563 = vmatpush3.msra.mxu1 %v2853_v32 }
 0x5df   :  { %2564 = vmatprep.subr.mxu1 %v2653_v5 }
 0x5e0   :  { %2565 = vmatpush3.msra.mxu1 %v2862_v33 }
 0x690   :  { %v1677_v16 = vpop.f32.mrf.mxu1  ;;  %v1749_v17 = vpop.f32.mrf.mxu0 }
 0x691   :  { %v1681_v29 = vadd.f32 %v1677_v16, %v206_v14  ;;  %v1750_v31 = vadd.f32 %v2893_v42, %v1749_v17 }
 0x692   :  { %v2524_v58 = vpop.f32.mrf.mxu1  ;;  %v2535_v59 = vpop.f32.mrf.mxu0 }
 0x693   :  { %2622 = vtanh.f32 %v1681_v29 }
 0x698   :  { %v1822_v61 = vpop.f32.mrf.mxu1 }
 0x699   :  { %v1826_v62 = vadd.f32 %v1822_v61, %v1750_v31 }
 0x69a   :  { %v2546_v32 = vpop.f32.mrf.mxu1 }
 0x69b   :  { %2624 = vtanh.f32 %v1826_v62 }
 0x6a0   :  { %v2623_v5 = vpop.eup %2622 }
 0x6a1   :  { %2556 = vmatmul.mubr.msk.f32.vlgmr.msra.gmra.mxu0 %vm209_vm3, %v2623_v5 }
 0x6a2   :  { %2570 = vmatpush3.msra.mxu0 %v1979_v12  ;;  %2577 = vmatprep.mubr.msk.f32.mxu0 %vm209_vm3, %v2911_v48 }
 0x6a3   :  { %2571 = vmatprep.subr.mxu0 %v1978_v63 }
 0x6a4   :  { %2572 = vmatpush3.msra.mxu0 %v1978_v63 }
 0x6a5   :  { %2573 = vmatprep.subr.mxu0 %v1977_v21 }
 0x6a6   :  { %2574 = vmatpush3.msra.mxu0 %v1977_v21 }
 0x6a7   :  { %2575 = vmatprep.subr.mxu0 %v1976_v23 }
 0x6a8   :  { %v2625_v33 = vpop.eup %2624  ;;  %2576 = vmatpush3.msra.mxu0 %v1976_v23 }
 0x6a9   :  { %2567 = vmatmul.mubr.msk.f32.vlgmr.msra.gmra.mxu1 %vm209_vm3, %v2625_v33  ;;  %2578 = vmatmul.mubr.msk.f32.vlgmr.msra.gmra.mxu0 %vm209_vm3, %v2949_v60 }
 0x6aa   :  { %2580 = vmatprep.mubr.msk.f32.mxu0 %vm209_vm3, %v2988_v15 }
 0x6ad   :  { %2581 = vmatmul.mubr.msk.f32.gmra.mxu0 %vm209_vm3, %v3027_v19 }
 0x6ae   :  { %2583 = vmatprep.mubr.msk.f32.mxu0 %vm209_vm3, %v3066_v18 }
 0x6b1   :  { %2584 = vmatmul.mubr.msk.f32.gmra.mxu0 %vm209_vm3, %v2621_v24 }
 0x6b2   :  { %2586 = vmatprep.mubr.msk.f32.mxu0 %vm209_vm3, %v2625_v33 }
 0x761   :  { %v1897_v48 = vpop.f32.mrf.mxu0 }
 0x762   :  { %v1898_v60 = vadd.f32 %v2893_v42, %v1897_v48 }
 0x763   :  { %v2557_v0 = vpop.f32.mrf.mxu0 }
 0x769   :  { %v1970_v2 = vpop.f32.mrf.mxu1  ;;  %v2579_v4 = vpop.f32.mrf.mxu0 }
 0x76a   :  { %v1974_v6 = vadd.f32 %v1970_v2, %v1898_v60  ;;  %v2062_v7 = vadd.f32 %v2579_v4, %v2141_v1 }
 0x76b   :  { %v2568_v9 = vpop.f32.mrf.mxu1  ;;  %v2056_v13 = vpop.f32.mrf.mxu0 }
 0x76c   :  { %2626 = vtanh.f32 %v1974_v6  ;;  %2096 = vst.msk [vmem:[%s3184_s9 + $0x8] sm:$0xff] %vm209_vm3, %v2062_v7  ;;  %v2057_v15 = vadd.f32 %v2141_v1, %v2056_v13 }
 0x76d   :  { %v2582_v20 = vpop.f32.mrf.mxu0 }
 0x76e   :  { %2095 = vst.msk [vmem:[%s3184_s9] sm:$0xff] %vm209_vm3, %v2057_v15  ;;  %v2072_v42 = vadd.f32 %v2582_v20, %v2141_v1 }
 0x76f   :  { %v2066_v22 = vpop.f32.mrf.mxu0 }
 0x770   :  { %2098 = vst.msk [vmem:[%s3184_s9 + $0x18] sm:$0xff] %vm209_vm3, %v2072_v42  ;;  %v2067_v25 = vadd.f32 %v2141_v1, %v2066_v22 }
 0x771   :  { %v2585_v26 = vpop.f32.mrf.mxu0 }
 0x772   :  { %2097 = vst.msk [vmem:[%s3184_s9 + $0x10] sm:$0xff] %vm209_vm3, %v2067_v25  ;;  %v2082_v27 = vadd.f32 %v2585_v26, %v2141_v1 }
 0x773   :  { %v2076_v28 = vpop.f32.mrf.mxu0 }
 0x774   :  { %2100 = vst.msk [vmem:[%s3184_s9 + $0x28] sm:$0xff] %vm209_vm3, %v2082_v27  ;;  %v2077_v30 = vadd.f32 %v2141_v1, %v2076_v28 }
 0x776   :  { %2099 = vst.msk [vmem:[%s3184_s9 + $0x20] sm:$0xff] %vm209_vm3, %v2077_v30 }
 0x779   :  { %v2627_v34 = vpop.eup %2626 }
 0x77a   :  { %2587 = vmatmul.mubr.msk.f32.gmra.mxu0 %vm209_vm3, %v2627_v34 }
 0x83a   :  { %v2588_v35 = vpop.f32.mrf.mxu0 }
 0x83b   :  { %v2092_v36 = vadd.f32 %v2588_v35, %v2141_v1 }
 0x83c   :  { %v2086_v37 = vpop.f32.mrf.mxu0 }
 0x83d   :  { %2102 = vst.msk [vmem:[%s3184_s9 + $0x38] sm:$0xff] %vm209_vm3, %v2092_v36  ;;  %v2087_v19 = vadd.f32 %v2141_v1, %v2086_v37 }
 0x83f   :  { %2101 = vst.msk [vmem:[%s3184_s9 + $0x30] sm:$0xff] %vm209_vm3, %v2087_v19 }
 0x840   :  { %2107 = vsyncpa [#allocation3], 1 }

</bundles_post_ra>
